<compile_context>
chip_gen: v6e
topology: v6e:2x2x1
jax: 0.10.0
libtpu: 0.0.40
codegen_flags: <defaults>
</compile_context>

<pallas_src>
import jax
import jax.numpy as jnp
from jax.experimental import pallas as pl
from jax.experimental.pallas import tpu as pltpu

# ------------------- model dimensions (sizes are free in the spec) ----------
INPUT_DIM = 256          # input_dimension            (fills 256x256 MXU on v6e/v7x)
HIDDEN1 = 256            # first_hidden_layer_neurons
HIDDEN2 = 256            # second_hidden_layer_neurons
OUT_DIM = 1              # fc3 output width (module-defined)
OUT_PAD = 128            # lane-dense padded fc3 width used ONLY inside the kernel
BATCH = 16               # small demo batch -> 2 grid steps of 8 rows
MAX_TILE_B = 2048        # batch-tile cap (sweep 2048-8192 at large B)


# ------------------------------ Pallas kernel -------------------------------
def mlp_kernel(x_ref, w1_ref, w2_ref, w3_ref, b_ref, o_ref):
    """out = relu(relu(x@W1 + b1)@W2 + b2)@W3pad + b3pad, store column 0 only.

    x arrives as f32 and is cast to bf16 in-kernel (VPU, hidden under DMA);
    matmuls are bf16 on the MXU with f32 accumulation; bias-add + ReLU stay
    f32 on the VPU. W3/b3 are zero-padded to OUT_PAD columns so the fc3
    matmul is lane-dense, but only the real OUT_DIM column is written back.
    """
    h1_dim = w1_ref.shape[1]
    h2_dim = w2_ref.shape[1]
    out_dim = o_ref.shape[1]

    x = x_ref[...].astype(jnp.bfloat16)            # (TB, D) f32 -> bf16 in-kernel

    b1 = b_ref[0:1, :h1_dim]                       # (1, H1) f32
    b2 = b_ref[1:2, :h2_dim]                       # (1, H2) f32
    b3 = b_ref[2:3, :w3_ref.shape[1]]              # (1, OUT_PAD) f32, [b3, 0, ...]

    h1 = jnp.dot(x, w1_ref[...], preferred_element_type=jnp.float32) + b1
    h1 = jnp.maximum(h1, 0.0).astype(jnp.bfloat16)

    h2 = jnp.dot(h1, w2_ref[...], preferred_element_type=jnp.float32) + b2
    h2 = jnp.maximum(h2, 0.0).astype(jnp.bfloat16)

    out = jnp.dot(h2, w3_ref[...], preferred_element_type=jnp.float32) + b3
    # Store only the real column: one masked vst per row tile is far cheaper
    # than writing (and later re-reading) 127 zero lanes of f32 per row.
    o_ref[...] = out[:, :out_dim]


# -------------------- one-time parameter preparation -------------------------
def prepare_params(params):
    """PyTorch-convention params -> kernel-ready params (call ONCE).

    Pre-transposes weights to (in, out), casts to bf16, zero-pads W3 to
    OUT_PAD output columns (lane-dense MXU), and packs b1/b2/b3 into one
    (8, max_width) f32 array (rows 0/1/2; rest zero). No per-call glue.
    """
    w1t = params["w1"].T.astype(jnp.bfloat16)                  # (D,  H1)
    w2t = params["w2"].T.astype(jnp.bfloat16)                  # (H1, H2)
    h1 = w1t.shape[1]
    h2 = w2t.shape[1]

    w3t = jnp.zeros((h2, OUT_PAD), jnp.bfloat16)
    w3t = w3t.at[:, :OUT_DIM].set(params["w3"].T.astype(jnp.bfloat16))

    bias_w = max(h1, h2, OUT_PAD)
    bias = jnp.zeros((8, bias_w), jnp.float32)
    bias = bias.at[0, :h1].set(params["b1"])
    bias = bias.at[1, :h2].set(params["b2"])
    bias = bias.at[2, :OUT_DIM].set(params["b3"])

    return {"w1t": w1t, "w2t": w2t, "w3t": w3t, "bias": bias}


# ------------------------------- wrapper -------------------------------------
def simple_nn_forward(x, prepared, *, max_tile_b=MAX_TILE_B):
    """x: (B, INPUT_DIM) f32. Returns (B, OUT_DIM) f32."""
    B, D = x.shape
    w1t, w2t, w3t, bias = (prepared["w1t"], prepared["w2t"],
                           prepared["w3t"], prepared["bias"])
    assert D == w1t.shape[0], (D, w1t.shape)

    # Batch-tile selection: large tiles (amortize ~0.35us/step), sublane
    # aligned, and >= 2 grid steps whenever B allows so both v7x TensorCores
    # get work under dimension_semantics=("parallel",).
    tile_b = min(max_tile_b, B)
    if tile_b == B and B > 8:
        tile_b = B // 2
    tile_b = max(8, (tile_b // 8) * 8)

    n_tiles = pl.cdiv(B, tile_b)
    b_padded = n_tiles * tile_b
    xp = x if b_padded == B else jnp.pad(x, ((0, b_padded - B), (0, 0)))
    # TODO(synk): for very large ragged batches, replace the pad with a
    # tail-masked last tile to avoid the extra copy of x.

    out = pl.pallas_call(
        mlp_kernel,
        out_shape=jax.ShapeDtypeStruct((b_padded, OUT_DIM), jnp.float32),
        grid_spec=pltpu.PrefetchScalarGridSpec(
            num_scalar_prefetch=0,
            grid=(n_tiles,),
            in_specs=[
                # activations: streamed over the batch grid (f32, cast in-kernel)
                pl.BlockSpec((tile_b, D), lambda i: (i, 0)),
                # weights / biases: same block every iteration -> VMEM-resident
                pl.BlockSpec(w1t.shape, lambda i: (0, 0)),
                pl.BlockSpec(w2t.shape, lambda i: (0, 0)),
                pl.BlockSpec(w3t.shape, lambda i: (0, 0)),
                pl.BlockSpec(bias.shape, lambda i: (0, 0)),
            ],
            # (tile_b, 1) block: last dim equals the full array dim -> legal,
            # and only the real column ever touches HBM.
            out_specs=pl.BlockSpec((tile_b, OUT_DIM), lambda i: (i, 0)),
        ),
        compiler_params=pltpu.CompilerParams(
            # batch axis is embarrassingly parallel -> megacore sharding
            dimension_semantics=("parallel",),
            # explicit budget with headroom; dominant consumer is the
            # double-buffered f32 input block (~4 MiB at tile_b=2048).
            vmem_limit_bytes=32 << 20,
        ),
    )(xp, w1t, w2t, w3t, bias)

    return out[:B]


# ------------------------- deterministic param init -------------------------
def init_params(key):
    """Mimics PyTorch nn.Linear default init: U(-1/sqrt(fan_in), 1/sqrt(fan_in))."""
    def linear_init(k, fan_in, fan_out):
        kw, kb = jax.random.split(k)
        bound = 1.0 / jnp.sqrt(fan_in)
        w = jax.random.uniform(kw, (fan_out, fan_in), jnp.float32, -bound, bound)
        b = jax.random.uniform(kb, (fan_out,), jnp.float32, -bound, bound)
        return w, b

    k1, k2, k3 = jax.random.split(key, 3)
    w1, b1 = linear_init(k1, INPUT_DIM, HIDDEN1)
    w2, b2 = linear_init(k2, HIDDEN1, HIDDEN2)
    w3, b3 = linear_init(k3, HIDDEN2, OUT_DIM)
    return {"w1": w1, "b1": b1, "w2": w2, "b2": b2, "w3": w3, "b3": b3}


def reference_forward(x, p):
    """Pure-JAX reference mirroring the kernel precision policy
    (bf16 MXU operands, f32 accumulation, f32 bias/ReLU).
    NOTE: this tracks the kernel's bf16 policy, not a pure-f32 PyTorch run;
    expect ~1e-2 relative drift vs a true-f32 reference."""
    xb = x.astype(jnp.bfloat16)
    w1b = p["w1"].astype(jnp.bfloat16)
    w2b = p["w2"].astype(jnp.bfloat16)
    w3b = p["w3"].astype(jnp.bfloat16)

    h1 = jnp.dot(xb, w1b.T, preferred_element_type=jnp.float32) + p["b1"]
    h1 = jnp.maximum(h1, 0.0).astype(jnp.bfloat16)
    h2 = jnp.dot(h1, w2b.T, preferred_element_type=jnp.float32) + p["b2"]
    h2 = jnp.maximum(h2, 0.0).astype(jnp.bfloat16)
    return jnp.dot(h2, w3b.T, preferred_element_type=jnp.float32) + p["b3"]


if __name__ == "__main__":
    key = jax.random.PRNGKey(0)
    k_params, k_x = jax.random.split(key)

    params = init_params(k_params)
    prepared = prepare_params(params)          # one-time weight prep
    x = jax.random.normal(k_x, (BATCH, INPUT_DIM), jnp.float32)

    out = simple_nn_forward(x, prepared)
    out = jax.block_until_ready(out)

    ref = reference_forward(x, params)
    assert out.shape == (BATCH, OUT_DIM), out.shape
    assert jnp.allclose(out, ref, atol=1e-3, rtol=1e-3), (
        f"max err {jnp.max(jnp.abs(out - ref))}")

    print("KERNEL_OK")
</pallas_src>

<mosaic_0001>
module attributes {stable_mosaic.version = 11 : i64} {
  func.func @mlp_kernel(%arg0: i32, %arg1: memref<8x256xf32, #tpu.memory_space<vmem>>, %arg2: memref<256x256xbf16, #tpu.memory_space<vmem>>, %arg3: memref<256x256xbf16, #tpu.memory_space<vmem>>, %arg4: memref<256x128xbf16, #tpu.memory_space<vmem>>, %arg5: memref<8x256xf32, #tpu.memory_space<vmem>>, %arg6: memref<8x1xf32, #tpu.memory_space<vmem>>) attributes {dimension_semantics = [#tpu.dimension_semantics<parallel>], iteration_bounds = array<i64: 2>, scalar_prefetch = 0 : i64, scratch_operands = 0 : i64, tpu.core_type = #tpu.core_type<tc>, window_params = [{transform_indices = @transform_0, window_bounds = array<i64: 8, 256>}, {pipeline_mode = #tpu.pipeline_mode<synchronous>, transform_indices = @transform_1, window_bounds = array<i64: 256, 256>}, {pipeline_mode = #tpu.pipeline_mode<synchronous>, transform_indices = @transform_2, window_bounds = array<i64: 256, 256>}, {pipeline_mode = #tpu.pipeline_mode<synchronous>, transform_indices = @transform_3, window_bounds = array<i64: 256, 128>}, {pipeline_mode = #tpu.pipeline_mode<synchronous>, transform_indices = @transform_4, window_bounds = array<i64: 8, 256>}, {transform_indices = @transform_5, window_bounds = array<i64: 8, 1>}]} {
    %c0 = arith.constant 0 : index
    %c0_0 = arith.constant 0 : index
    %0 = vector.load %arg1[%c0, %c0_0] : memref<8x256xf32, #tpu.memory_space<vmem>>, vector<8x256xf32>
    %1 = arith.truncf %0 : vector<8x256xf32> to vector<8x256xbf16>
    %c0_1 = arith.constant 0 : index
    %c0_2 = arith.constant 0 : index
    %2 = vector.load %arg5[%c0_1, %c0_2] : memref<8x256xf32, #tpu.memory_space<vmem>>, vector<1x256xf32>
    %c1 = arith.constant 1 : index
    %c0_3 = arith.constant 0 : index
    %3 = vector.load %arg5[%c1, %c0_3] : memref<8x256xf32, #tpu.memory_space<vmem>>, vector<1x256xf32>
    %c2 = arith.constant 2 : index
    %c0_4 = arith.constant 0 : index
    %4 = vector.load %arg5[%c2, %c0_4] : memref<8x256xf32, #tpu.memory_space<vmem>>, vector<1x128xf32>
    %c0_5 = arith.constant 0 : index
    %c0_6 = arith.constant 0 : index
    %5 = vector.load %arg2[%c0_5, %c0_6] : memref<256x256xbf16, #tpu.memory_space<vmem>>, vector<256x256xbf16>
    %cst = arith.constant dense<0.000000e+00> : vector<8x256xf32>
    %6 = tpu.matmul %1, %5, %cst {dimension_numbers = #tpu.dot_dimension_numbers<[1], [0], [0], [1], [0, 0, 1, 1], [], []>} : vector<8x256xbf16>, vector<256x256xbf16>, vector<8x256xf32> -> vector<8x256xf32>
    %7 = vector.broadcast %2 : vector<1x256xf32> to vector<8x256xf32>
    %8 = arith.addf %6, %7 : vector<8x256xf32>
    %cst_7 = arith.constant 0.000000e+00 : f32
    %9 = vector.broadcast %cst_7 : f32 to vector<8x256xf32>
    %10 = arith.maximumf %8, %9 : vector<8x256xf32>
    %11 = arith.truncf %10 : vector<8x256xf32> to vector<8x256xbf16>
    %c0_8 = arith.constant 0 : index
    %c0_9 = arith.constant 0 : index
    %12 = vector.load %arg3[%c0_8, %c0_9] : memref<256x256xbf16, #tpu.memory_space<vmem>>, vector<256x256xbf16>
    %cst_10 = arith.constant dense<0.000000e+00> : vector<8x256xf32>
    %13 = tpu.matmul %11, %12, %cst_10 {dimension_numbers = #tpu.dot_dimension_numbers<[1], [0], [0], [1], [0, 0, 1, 1], [], []>} : vector<8x256xbf16>, vector<256x256xbf16>, vector<8x256xf32> -> vector<8x256xf32>
    %14 = vector.broadcast %3 : vector<1x256xf32> to vector<8x256xf32>
    %15 = arith.addf %13, %14 : vector<8x256xf32>
    %cst_11 = arith.constant 0.000000e+00 : f32
    %16 = vector.broadcast %cst_11 : f32 to vector<8x256xf32>
    %17 = arith.maximumf %15, %16 : vector<8x256xf32>
    %18 = arith.truncf %17 : vector<8x256xf32> to vector<8x256xbf16>
    %c0_12 = arith.constant 0 : index
    %c0_13 = arith.constant 0 : index
    %19 = vector.load %arg4[%c0_12, %c0_13] : memref<256x128xbf16, #tpu.memory_space<vmem>>, vector<256x128xbf16>
    %cst_14 = arith.constant dense<0.000000e+00> : vector<8x128xf32>
    %20 = tpu.matmul %18, %19, %cst_14 {dimension_numbers = #tpu.dot_dimension_numbers<[1], [0], [0], [1], [0, 0, 1, 1], [], []>} : vector<8x256xbf16>, vector<256x128xbf16>, vector<8x128xf32> -> vector<8x128xf32>
    %21 = vector.broadcast %4 : vector<1x128xf32> to vector<8x128xf32>
    %22 = arith.addf %20, %21 : vector<8x128xf32>
    %23 = vector.extract_strided_slice %22 {offsets = [0, 0], sizes = [8, 1], strides = [1, 1]} : vector<8x128xf32> to vector<8x1xf32>
    %c0_15 = arith.constant 0 : index
    %c0_16 = arith.constant 0 : index
    %24 = vector.load %arg6[%c0_15, %c0_16] : memref<8x1xf32, #tpu.memory_space<vmem>>, vector<8x1xf32>
    tpu.vector_store %arg6[%c0_15, %c0_16], %23 {strides = array<i32>} : memref<8x1xf32, #tpu.memory_space<vmem>>, vector<8x1xf32>,
    return
  }
  func.func @transform_0(%arg0: i32) -> (i32, i32) {
    %c0_i32 = arith.constant 0 : i32
    %c0_i32_0 = arith.constant 0 : i32
    return %arg0, %c0_i32 : i32, i32
  }
  func.func @transform_1(%arg0: i32) -> (i32, i32) {
    %c0_i32 = arith.constant 0 : i32
    %c0_i32_0 = arith.constant 0 : i32
    %c0_i32_1 = arith.constant 0 : i32
    return %c0_i32, %c0_i32_0 : i32, i32
  }
  func.func @transform_2(%arg0: i32) -> (i32, i32) {
    %c0_i32 = arith.constant 0 : i32
    %c0_i32_0 = arith.constant 0 : i32
    %c0_i32_1 = arith.constant 0 : i32
    return %c0_i32, %c0_i32_0 : i32, i32
  }
  func.func @transform_3(%arg0: i32) -> (i32, i32) {
    %c0_i32 = arith.constant 0 : i32
    %c0_i32_0 = arith.constant 0 : i32
    %c0_i32_1 = arith.constant 0 : i32
    return %c0_i32, %c0_i32_0 : i32, i32
  }
  func.func @transform_4(%arg0: i32) -> (i32, i32) {
    %c0_i32 = arith.constant 0 : i32
    %c0_i32_0 = arith.constant 0 : i32
    %c0_i32_1 = arith.constant 0 : i32
    return %c0_i32, %c0_i32_0 : i32, i32
  }
  func.func @transform_5(%arg0: i32) -> (i32, i32) {
    %c0_i32 = arith.constant 0 : i32
    %c0_i32_0 = arith.constant 0 : i32
    return %arg0, %c0_i32 : i32, i32
  }
}

</mosaic_0001>

<bundles_post_ra>
// kernel: tpu_custom_call.1
= control target key start
LH: loop header
LB: loop body
LE: loop exit
PB: predicated region body
PF: predicated region fallthrough
CT: control target
= control target key end

     0   :  { %10 = vsyncpa [#allocation3], 0  ;;  %s1776_s0 = inlined_call_operand.hbm [shape: f32[16,256], index: 0, kind: input, shape index: {}]   ;;  %s1777_s1 = inlined_call_operand.hbm [shape: bf16[256,256], index: 1, kind: input, shape index: {}]   ;;  %s1778_s2 = inlined_call_operand.hbm [shape: bf16[256,256], index: 2, kind: input, shape index: {}]   ;;  %s1779_s3 = inlined_call_operand.hbm [shape: bf16[256,128], index: 3, kind: input, shape index: {}]   ;;  %s1780_s4 = inlined_call_operand.hbm [shape: f32[8,256], index: 4, kind: input, shape index: {}]   ;;  %s1781_s5 = inlined_call_operand.vmem [shape: f32[16,1], index: 5, kind: output, shape index: {}]  }
   0x1   :  { %12 = vsyncpa [#allocation3 + $0x1], 0 }
   0x2   :  { %13 = vsyncpa [#allocation5], 0 }
   0x3   :  { %14 = vsyncpa [#allocation8], 0  ;;  %s1608_s18 = smov 0   ;;  %s1610_s19 = smov 0  }
   0x4   :  { %s1612_s20 = smov 0   ;;  %s1614_s21 = smov 0  }
   0x5 LB: > { %s1569_s22 = smov [#allocation4]   ;;  %s1629_s24 = sadd.s32 4294967295, %s1567_s21   ;;  %s1567_s21 = sphi %s1614_s21, %s1798_s21   ;;  %s1563_s20 = sphi %s1612_s20, %s1797_s20   ;;  %s1559_s19 = sphi %s1610_s19, %s1796_s19   ;;  %s1555_s18 = sphi %s1608_s18, %s1795_s18  }
   0x6   : > { %s173_s23 = sshll.u32 %s1569_s22, 4  ;;  %p1076_p0 = scmp.ge.s32.totalorder %s1567_s21, 1  ;;  %s174_s23 = int_to_ptr.vmem [resolvable:$true] %s173_s23 }
   0x7   : > { %p1782_p1 = scmp.eq.s32.totalorder %s1629_s24, 0  ;;  %p161_p2 = scmp.lt.s32.totalorder %s1567_s21, 3 }
   0x8   : > { %s1570_s26 = smov [#allocation7]   ;;  %s1571_s29 = smov [#allocation6]  }
   0x9   : > { %p1634_p3 = pnand %p1076_p0, %p161_p2  ;;  %s199_s27 = sshll.u32 %s1570_s26, 4  ;;  %s1646_s27 = int_to_ptr.vmem [resolvable:$true] %s199_s27 }
   0xa   : > { %s1648_s30 = sshll.u32 %s1571_s29, 4  ;;  %s1404_s6 = scalar_lea.vmem %s174_s23, 4096  ;;  %s187_s30 = int_to_ptr.vmem [resolvable:$true] %s1648_s30 }
   0xb   : > { %s1785_s25 = scalar_select %p1634_p3, 1, 0 }
   0xc   : > { %p1215_p4 = pneg %p1634_p3  ;;  %p1405_p7 = scmp.ne.s32.totalorder %s174_s23, %s1404_s6 }
   0xd   : > { %p1412_p10 = scmp.lt.s32.totalorder %s174_s23, %s174_s23  ;;  %p1413_p11 = scmp.lt.s32.totalorder %s1404_s6, %s1404_s6 }
   0xe   : > { %p1642_p5 = pnand %p1215_p4, %p1782_p1 }
   0xf   : > { %p1414_p12 = por %p1413_p11, %p1412_p10 }
  0x10   : > { %p1395_p6 = pneg %p1642_p5 }
  0x12   : > { %p1407_p8 = pnand %p1405_p7, %p1395_p6 }
  0x14   : > { %p1408_p9 = pneg %p1407_p8 }
  0x16   : > { %p1415_p13 = pnand %p1414_p12, %p1408_p9 }
  0x18   : > { %1418 = shalt.err (!%p1415_p13)
}
  0x19   : > { %s1572_s7 = smov 128   ;;  %s1573_s8 = smov 8  }
  0x1a   : > { %1218 = dma.hbm_to_vmem [thread:$0]  (!%p1642_p5), %s1777_s1, 4096, %s174_s23, [#allocation5], %s1572_s7, %s1572_s7, %s1573_s8  }
  0x1b   : > { %s1430_s11 = scalar_lea.vmem %s1646_s27, 2048  ;;  %p1438_p7 = scmp.lt.s32.totalorder %s1646_s27, %s1646_s27 }
  0x1c   : > { %p1431_p0 = scmp.ne.s32.totalorder %s1646_s27, %s1430_s11  ;;  %p1439_p8 = scmp.lt.s32.totalorder %s1430_s11, %s1430_s11 }
  0x1e   : > { %p1433_p2 = pnand %p1431_p0, %p1395_p6  ;;  %p1440_p9 = por %p1439_p8, %p1438_p7 }
  0x20   : > { %p1434_p4 = pneg %p1433_p2 }
  0x22   : > { %p1441_p10 = pnand %p1440_p9, %p1434_p4 }
  0x24   : > { %1444 = shalt.err (!%p1441_p10)
}
  0x25   : > { %s1574_s12 = smov 64   ;;  %s1575_s13 = smov 4  }
  0x26   : > { %1224 = dma.hbm_to_vmem [thread:$0]  (!%p1642_p5), %s1779_s3, 2048, %s1646_s27, [#allocation8], %s1574_s12, %s1574_s12, %s1575_s13  }
  0x27   : > { %s1456_s16 = scalar_lea.vmem %s187_s30, 4096  ;;  %p1464_p0 = scmp.lt.s32.totalorder %s187_s30, %s187_s30 }
  0x28   : > { %p1457_p11 = scmp.ne.s32.totalorder %s187_s30, %s1456_s16  ;;  %p1465_p2 = scmp.lt.s32.totalorder %s1456_s16, %s1456_s16 }
  0x2a   : > { %p1459_p12 = pnand %p1457_p11, %p1395_p6  ;;  %p1466_p4 = por %p1465_p2, %p1464_p0 }
  0x2c   : > { %p1460_p13 = pneg %p1459_p12 }
  0x2e   : > { %p1467_p7 = pnand %p1466_p4, %p1460_p13 }
  0x30   : > { %1470 = shalt.err (!%p1467_p7)
}
  0x31   : > { %1221 = dma.hbm_to_vmem [thread:$0]  (!%p1642_p5), %s1778_s2, 4096, %s187_s30, [#allocation5], %s1572_s7, %s1572_s7, %s1573_s8  }
  0x32   : > { %s1576_s23 = smov [#allocation9]  }
  0x33   : > { %s213_s26 = sshll.u32 %s1576_s23, 4  ;;  %s214_s26 = int_to_ptr.vmem [resolvable:$true] %s213_s26 }
  0x34   : > { %s1482_s27 = scalar_lea.vmem %s214_s26, 256  ;;  %p1490_p11 = scmp.lt.s32.totalorder %s214_s26, %s214_s26 }
  0x35   : > { %p1483_p8 = scmp.ne.s32.totalorder %s214_s26, %s1482_s27  ;;  %p1491_p12 = scmp.lt.s32.totalorder %s1482_s27, %s1482_s27 }
  0x37   : > { %p1485_p9 = pnand %p1483_p8, %p1395_p6  ;;  %p1492_p13 = por %p1491_p12, %p1490_p11 }
  0x39   : > { %p1486_p10 = pneg %p1485_p9 }
  0x3b   : > { %p1493_p0 = pnand %p1492_p13, %p1486_p10 }
  0x3d   : > { %1496 = shalt.err (!%p1493_p0)
}
  0x3e   : > { %1227 = dma.hbm_to_vmem [thread:$0]  (!%p1642_p5), %s1780_s4, 256, %s214_s26, [#allocation8]  }
  0x3f   : > { %s1691_s30 = sadd.s32 1, %s1567_s21   ;;  %s27_s28 = sadd.s32 1, %s1563_s20 }
  0x40   : > { %s24_s7 = ssub.s32 %s1567_s21, %s1691_s30  ;;  %p34_p6 = scmp.ne.s32.totalorder %s1563_s20, %s1559_s19 }
  0x41   : > { %p25_p2 = scmp.eq.s32.totalorder %s24_s7, 0  ;;  %p35_p4 = scmp.eq.s32.totalorder %s1567_s21, 0 }
  0x42   : > { %p40_p7 = scmp.ne.s32.totalorder %s1559_s19, %s1555_s18  ;;  %p1236_p8 = scmp.lt.s32.totalorder %s1567_s21, 2 }
  0x43   : > { %s1703_s8 = scalar_select %p25_p2, %s1563_s20, %s27_s28  }
  0x44   : > { %p36_p9 = por %p35_p4, %p34_p6  ;;  %p1707_p10 = por %p1782_p1, %p40_p7 }
  0x45   : > { %s224_s10 = sand.u32 1, %s1563_s20   ;;  %s1174_s11 = sshll.u32 %s1567_s21, 8 }
  0x46   : > { %s1787_s9 = scalar_select %p1707_p10, 1, 0 }
  0x47   : > { %s1082_s12 = sshll.u32 %s224_s10, 4  ;;  %s1716_s15 = scalar_lea.hbm %s1776_s0, %s1174_s11 }
  0x48   : > { %s228_s18 = scalar_lea.vmem [#allocation2], %s1082_s12  ;;  %p1718_p5 = pnand %p1236_p8, %p36_p9 }
  0x49   : > { %s236_s16 = sshll.u32 %s228_s18, 4  ;;  %s225_s22 = scalar_lea.sflag [#allocation3], %s224_s10  ;;  %s237_s16 = int_to_ptr.vmem [resolvable:$true] %s236_s16 }
  0x4a   : > { %s1497_s23 = scalar_lea.hbm %s1716_s15, 256  ;;  %p1499_p12 = pneg %p1718_p5 }
  0x4b   : > { %p1498_p11 = scmp.ne.s32.totalorder %s1716_s15, %s1497_s23  ;;  %s1502_s27 = scalar_lea.hbm %s1776_s0, 512 }
  0x4c   : > { %p1503_p6 = scmp.lt.s32.totalorder %s1716_s15, %s1776_s0  ;;  %p1504_p2 = scmp.lt.s32.totalorder %s1502_s27, %s1497_s23 }
  0x4d   : > { %p1500_p13 = pnand %p1499_p12, %p1498_p11 }
  0x4e   : > { %p1505_p4 = por %p1504_p2, %p1503_p6 }
  0x4f   : > { %p1501_p0 = pneg %p1500_p13 }
  0x51   : > { %p1506_p7 = pnand %p1505_p4, %p1501_p0 }
  0x53   : > { %1509 = shalt.err (!%p1506_p7)
}
  0x54   : > { %s1510_s28 = scalar_lea.vmem %s237_s16, 256  ;;  %s1577_s7 = smov [#allocation2]  }
  0x55   : > { %p1511_p8 = scmp.ne.s32.totalorder %s237_s16, %s1510_s28  ;;  %s1515_s10 = sshll.u32 %s1577_s7, 4  ;;  %s1516_s10 = int_to_ptr.vmem [resolvable:$false] %s1515_s10 }
  0x56   : > { %s1517_s11 = scalar_lea.vmem %s1516_s10, 512  ;;  %p1518_p11 = scmp.lt.s32.totalorder %s237_s16, %s1516_s10 }
  0x57   : > { %p1513_p9 = pnand %p1511_p8, %p1499_p12  ;;  %p1519_p13 = scmp.lt.s32.totalorder %s1517_s11, %s1510_s28 }
  0x59   : > { %p1514_p1 = pneg %p1513_p9  ;;  %p1520_p10 = por %p1519_p13, %p1518_p11 }
  0x5b   : > { %p1521_p3 = pnand %p1520_p10, %p1514_p1 }
  0x5d   : > { %1524 = shalt.err (!%p1521_p3)
}
  0x5e   : > { %1231 = dma.hbm_to_vmem [thread:$0]  (!%p1718_p5), %s1716_s15, 256, %s237_s16, %s225_s22  }
  0x5f   : > { %p1789_p0 = scmp.ne.s32.totalorder %s1785_s25, 0 }
  0x60   : > { %s247_s12 = sand.u32 (!%p1789_p0), 1, %s1559_s19   ;;  %p1790_p12 = scmp.ne.s32.totalorder (!%p1789_p0), %s1787_s9, 0 }
  0x61   : > { %245 = sbr.rel (%p1789_p0) target bundleno = 778 (0x30a), region = 40  ;;  %s1739_s13 = sshll.u32 (!%p1789_p0), %s247_s12, 4 }
  0x62   : > { %s248_s14 = scalar_lea.sflag (!%p1789_p0), [#allocation3], %s247_s12  ;;  %s251_s18 = scalar_lea.vmem (!%p1789_p0), [#allocation2], %s1739_s13 }
  0x66   : > { %1542 = dma.done.wait (%p1790_p12), %s248_s14, 256  }
  0x67   : > { %1544 = vsyncadd (%p1790_p12), %s248_s14, 4294967040  ;;  %p1791_p1 = scmp.eq.s32.totalorder %s1629_s24, 0 }
  0x69   : > { %1546 = dma.done.wait (%p1791_p1), [#allocation5], 8192   ;;  %p1792_p3 = pmov %p1791_p1 }
  0x6a   : > { %p1793_p10 = pmov %p1791_p1 }
  0x6b   : > { %1548 = vsyncadd (%p1792_p3), [#allocation5], 4294959104 }
  0x6c   : > { %1550 = dma.done.wait (%p1793_p10), [#allocation8], 2304   ;;  %p1794_p5 = pmov %p1791_p1 }
  0x6d   : > { %v1281_v0 = vld [vmem:[#allocation4 + $0x74] ss:$8 sps:$4 sm:$0xff]   ;;  %v1283_v1 = vld [vmem:[#allocation4 + $0x70] ss:$8 sps:$4 sm:$0xff]   ;;  %v1284_v2 = vld [vmem:[#allocation4 + $0x64] ss:$8 sps:$4 sm:$0xff]  }
  0x6e   : > { %1552 = vsyncadd (%p1794_p5), [#allocation8], 4294964992  ;;  %509 = vmatprep.subr.bf16.mxu0 %v1281_v0  ;;  %v1286_v3 = vld [vmem:[#allocation4 + $0x60] ss:$8 sps:$4 sm:$0xff]   ;;  %v1287_v4 = vld [vmem:[#allocation4 + $0x54] ss:$8 sps:$4 sm:$0xff]  }
  0x6f   : > { %510 = vmatpush1.bf16.msra.mxu0 %v1283_v1  ;;  %v1289_v5 = vld [vmem:[#allocation4 + $0x50] ss:$8 sps:$4 sm:$0xff]   ;;  %v1290_v6 = vld [vmem:[#allocation4 + $0x44] ss:$8 sps:$4 sm:$0xff]   ;;  %v1292_v7 = vld [vmem:[#allocation4 + $0x40] ss:$8 sps:$4 sm:$0xff]  }
  0x70   : > { %511 = vmatprep.subr.bf16.mxu0 %v1284_v2  ;;  %v1293_v8 = vld [vmem:[#allocation4 + $0x34] ss:$8 sps:$4 sm:$0xff]   ;;  %v1295_v9 = vld [vmem:[#allocation4 + $0x30] ss:$8 sps:$4 sm:$0xff]   ;;  %v1296_v10 = vld [vmem:[#allocation4 + $0x24] ss:$8 sps:$4 sm:$0xff]  }
  0x71   : > { %v1298_v11 = vld [vmem:[#allocation4 + $0x20] ss:$8 sps:$4 sm:$0xff]   ;;  %v1299_v12 = vld [vmem:[#allocation4 + $0x14] ss:$8 sps:$4 sm:$0xff]   ;;  %v1301_v13 = vld [vmem:[#allocation4 + $0x10] ss:$8 sps:$4 sm:$0xff]  }
  0x72   : > { %v299_v14 = vld [vmem:[%s251_s18 + $0x8] sm:$0xff]  ;;  %v298_v54 = vld [vmem:[%s251_s18] sm:$0xff]  ;;  %p293_p6 = scmp.lt.s32.totalorder %s1629_s24, 1  ;;  %vm970_vm0 = vcmask 7168  }
  0x73   : > { %512 = vmatpush1.bf16.msra.mxu0 %v1286_v3  ;;  %v301_v15 = vpack.c.bf16 %v299_v14, %v299_v14  ;;  %v1329_v16 = vld [vmem:[#allocation6 + $0x74] ss:$8 sps:$4 sm:$0xff]   ;;  %v1331_v17 = vld [vmem:[#allocation6 + $0x70] ss:$8 sps:$4 sm:$0xff]   ;;  %v1302_v18 = vld [vmem:[#allocation4 + $0x4] ss:$8 sps:$4 sm:$0xff]   ;;  %v300_v56 = vpack.c.bf16 %v298_v54, %v298_v54 }
  0x74   : > { %513 = vmatprep.subr.bf16.mxu0 %v1287_v4  ;;  %v1332_v19 = vld [vmem:[#allocation6 + $0x64] ss:$8 sps:$4 sm:$0xff]   ;;  %v1304_v20 = vld [vmem:[#allocation4] ss:$8 sps:$4 sm:$0xff]   ;;  %757 = vmatprep.subr.bf16.mxu1 %v1329_v16  ;;  %v1335_v22 = vld [vmem:[#allocation6 + $0x54] ss:$8 sps:$4 sm:$0xff]   ;;  %v339_v16 = vlaneseq }
  0x75   : > { %541 = vmatprep.mubr.bf16.mxu0 %v301_v15  ;;  %758 = vmatpush1.bf16.msra.mxu1 %v1331_v17  ;;  %v1334_v21 = vld [vmem:[#allocation6 + $0x60] ss:$8 sps:$4 sm:$0xff]   ;;  %v1305_v23 = vld [vmem:[#allocation4 + $0xf4] ss:$8 sps:$4 sm:$0xff]   ;;  %v1307_v24 = vld [vmem:[#allocation4 + $0xf0] ss:$8 sps:$4 sm:$0xff]  }
  0x76   : > { %759 = vmatprep.subr.bf16.mxu1 %v1332_v19  ;;  %v1337_v25 = vld [vmem:[#allocation6 + $0x50] ss:$8 sps:$4 sm:$0xff]   ;;  %v1338_v26 = vld [vmem:[#allocation6 + $0x44] ss:$8 sps:$4 sm:$0xff]   ;;  %v1310_v28 = vld [vmem:[#allocation4 + $0xe0] ss:$8 sps:$4 sm:$0xff]  }
  0x77   : > { %514 = vmatpush1.bf16.msra.mxu0 %v1289_v5  ;;  %v1308_v27 = vld [vmem:[#allocation4 + $0xe4] ss:$8 sps:$4 sm:$0xff]   ;;  %v1340_v29 = vld [vmem:[#allocation6 + $0x40] ss:$8 sps:$4 sm:$0xff]   ;;  %v1341_v30 = vld [vmem:[#allocation6 + $0x34] ss:$8 sps:$4 sm:$0xff]  }
  0x78   : > { %515 = vmatprep.subr.bf16.mxu0 %v1290_v6  ;;  %v1311_v31 = vld [vmem:[#allocation4 + $0xd4] ss:$8 sps:$4 sm:$0xff]   ;;  %v1313_v32 = vld [vmem:[#allocation4 + $0xd0] ss:$8 sps:$4 sm:$0xff]   ;;  %v1344_v34 = vld [vmem:[#allocation6 + $0x24] ss:$8 sps:$4 sm:$0xff]  }
  0x79   : > { %760 = vmatpush1.bf16.msra.mxu1 %v1334_v21  ;;  %v1343_v33 = vld [vmem:[#allocation6 + $0x30] ss:$8 sps:$4 sm:$0xff]   ;;  %v1314_v35 = vld [vmem:[#allocation4 + $0xc4] ss:$8 sps:$4 sm:$0xff]   ;;  %v1346_v36 = vld [vmem:[#allocation6 + $0x20] ss:$8 sps:$4 sm:$0xff]  }
  0x7a   : > { %761 = vmatprep.subr.bf16.mxu1 %v1335_v22  ;;  %v1316_v37 = vld [vmem:[#allocation4 + $0xc0] ss:$8 sps:$4 sm:$0xff]   ;;  %v1347_v38 = vld [vmem:[#allocation6 + $0x14] ss:$8 sps:$4 sm:$0xff]   ;;  %v1349_v40 = vld [vmem:[#allocation6 + $0x10] ss:$8 sps:$4 sm:$0xff]  }
  0x7b   : > { %516 = vmatpush1.bf16.msra.mxu0 %v1292_v7  ;;  %v1317_v39 = vld [vmem:[#allocation4 + $0xb4] ss:$8 sps:$4 sm:$0xff]   ;;  %v1319_v41 = vld [vmem:[#allocation4 + $0xb0] ss:$8 sps:$4 sm:$0xff]   ;;  %v1350_v42 = vld [vmem:[#allocation6 + $0x4] ss:$8 sps:$4 sm:$0xff]  }
  0x7c   : > { %517 = vmatprep.subr.bf16.mxu0 %v1293_v8  ;;  %v1320_v43 = vld [vmem:[#allocation4 + $0xa4] ss:$8 sps:$4 sm:$0xff]   ;;  %v1352_v44 = vld [vmem:[#allocation6] ss:$8 sps:$4 sm:$0xff]   ;;  %v1353_v46 = vld [vmem:[#allocation6 + $0xf4] ss:$8 sps:$4 sm:$0xff]  }
  0x7d   : > { %762 = vmatpush1.bf16.msra.mxu1 %v1337_v25  ;;  %v1322_v45 = vld [vmem:[#allocation4 + $0xa0] ss:$8 sps:$4 sm:$0xff]   ;;  %v1323_v47 = vld [vmem:[#allocation4 + $0x94] ss:$8 sps:$4 sm:$0xff]   ;;  %v1355_v48 = vld [vmem:[#allocation6 + $0xf0] ss:$8 sps:$4 sm:$0xff]  }
  0x7e   : > { %763 = vmatprep.subr.bf16.mxu1 %v1338_v26  ;;  %v1325_v49 = vld [vmem:[#allocation4 + $0x90] ss:$8 sps:$4 sm:$0xff]   ;;  %v1356_v50 = vld [vmem:[#allocation6 + $0xe4] ss:$8 sps:$4 sm:$0xff]   ;;  %v1358_v52 = vld [vmem:[#allocation6 + $0xe0] ss:$8 sps:$4 sm:$0xff]  }
  0x7f   : > { %518 = vmatpush1.bf16.msra.mxu0 %v1295_v9  ;;  %v1326_v51 = vld [vmem:[#allocation4 + $0x84] ss:$8 sps:$4 sm:$0xff]   ;;  %v1328_v53 = vld [vmem:[#allocation4 + $0x80] ss:$8 sps:$4 sm:$0xff]   ;;  %v1359_v55 = vld [vmem:[#allocation6 + $0xd4] ss:$8 sps:$4 sm:$0xff]  }
  0x80   : > { %519 = vmatprep.subr.bf16.mxu0 %v1296_v10  ;;  %v1361_v57 = vld [vmem:[#allocation6 + $0xd0] ss:$8 sps:$4 sm:$0xff]   ;;  %v1362_v58 = vld [vmem:[#allocation6 + $0xc4] ss:$8 sps:$4 sm:$0xff]   ;;  %v1364_v59 = vld [vmem:[#allocation6 + $0xc0] ss:$8 sps:$4 sm:$0xff]  }
  0x81   : > { %764 = vmatpush1.bf16.msra.mxu1 %v1340_v29  ;;  %v1365_v60 = vld [vmem:[#allocation6 + $0xb4] ss:$8 sps:$4 sm:$0xff]   ;;  %v1367_v61 = vld [vmem:[#allocation6 + $0xb0] ss:$8 sps:$4 sm:$0xff]   ;;  %v1368_v62 = vld [vmem:[#allocation6 + $0xa4] ss:$8 sps:$4 sm:$0xff]  }
  0x82   : > { %765 = vmatprep.subr.bf16.mxu1 %v1341_v30  ;;  %v1370_v63 = vld [vmem:[#allocation6 + $0xa0] ss:$8 sps:$4 sm:$0xff]   ;;  %v1371_v0 = vld [vmem:[#allocation6 + $0x94] ss:$8 sps:$4 sm:$0xff]   ;;  %v1373_v1 = vld [vmem:[#allocation6 + $0x90] ss:$8 sps:$4 sm:$0xff]  }
  0x83   : > { %520 = vmatpush1.bf16.msra.mxu0 %v1298_v11  ;;  %v1374_v2 = vld [vmem:[#allocation6 + $0x84] ss:$8 sps:$4 sm:$0xff]   ;;  %v1376_v3 = vld [vmem:[#allocation6 + $0x80] ss:$8 sps:$4 sm:$0xff]   ;;  %v1377_v4 = vld [vmem:[#allocation7 + $0x78] sm:$0xff]   ;;  %v340_v17 = vshrl.u32 %v339_v16, 7 }
  0x84   : > { %521 = vmatprep.subr.bf16.mxu0 %v1299_v12  ;;  %v1378_v5 = vld [vmem:[#allocation7 + $0x38] sm:$0xff]   ;;  %v1379_v6 = vld [vmem:[#allocation7 + $0x70] sm:$0xff]   ;;  %v1381_v8 = vld [vmem:[#allocation7 + $0x68] sm:$0xff]   ;;  %s1800_s24 = smov (!%p293_p6, %s1629_s24), 1 }
  0x85   : > { %766 = vmatpush1.bf16.msra.mxu1 %v1343_v33  ;;  %v1380_v7 = vld [vmem:[#allocation7 + $0x30] sm:$0xff]   ;;  %v1382_v9 = vld [vmem:[#allocation7 + $0x28] sm:$0xff]   ;;  %v1383_v10 = vld [vmem:[#allocation7 + $0x60] sm:$0xff]   ;;  %s1091_s25 = sshll.u32 %s1800_s24, 3 }
  0x86   : > { %767 = vmatprep.subr.bf16.mxu1 %v1344_v34  ;;  %v1384_v11 = vld [vmem:[#allocation7 + $0x20] sm:$0xff]   ;;  %v1385_v12 = vld [vmem:[#allocation7 + $0x58] sm:$0xff]   ;;  %v1387_v14 = vld [vmem:[#allocation7 + $0x50] sm:$0xff]   ;;  %s296_s16 = scalar_lea.vmem %s1781_s5, %s1091_s25 }
  0x87   : > { %522 = vmatpush1.bf16.msra.mxu0 %v1301_v13  ;;  %v1386_v13 = vld [vmem:[#allocation7 + $0x18] sm:$0xff]   ;;  %v1388_v15 = vld [vmem:[#allocation7 + $0x10] sm:$0xff]   ;;  %v302_v19 = vld [vmem:[#allocation9] ss:$8 sm:$0x3] }
  0x88   : > { %523 = vmatprep.subr.bf16.mxu0 %v1302_v18  ;;  %v341_v18 = vsub.s32 0, %v340_v17  ;;  %v1389_v33 = vld [vmem:[#allocation7 + $0x48] sm:$0xff]  }
  0x89   : > { %768 = vmatpush1.bf16.msra.mxu1 %v1346_v36  ;;  %v1390_v34 = vld [vmem:[#allocation7 + $0x8] sm:$0xff]   ;;  %v1392_v36 = vld [vmem:[#allocation7] sm:$0xff]  }
  0x8a   : > { %769 = vmatprep.subr.bf16.mxu1 %v1347_v38  ;;  %v342_v21 = vrot.slane %v302_v19, %v341_v18 }
  0x8b   : > { %524 = vmatpush1.bf16.msra.mxu0 %v1304_v20  ;;  %v345_v20 = vsub.s32 1, %v340_v17 }
  0x8c   : > { %525 = vmatprep.subr.bf16.mxu0 %v1305_v23 }
  0x8d   : > { %770 = vmatpush1.bf16.msra.mxu1 %v1349_v40  ;;  %v346_v22 = vrot.slane %v302_v19, %v345_v20 }
  0x8e   : > { %771 = vmatprep.subr.bf16.mxu1 %v1350_v42 }
  0x8f   : > { %526 = vmatpush2.bf16.msra.mxu0 %v1307_v24 }
  0x90   : > { %527 = vmatprep.subr.bf16.mxu0 %v1308_v27 }
  0x91   : > { %772 = vmatpush1.bf16.msra.mxu1 %v1352_v44 }
  0x92   : > { %773 = vmatprep.subr.bf16.mxu1 %v1353_v46 }
  0x93   : > { %528 = vmatpush2.bf16.msra.mxu0 %v1310_v28 }
  0x94   : > { %529 = vmatprep.subr.bf16.mxu0 %v1311_v31 }
  0x95   : > { %774 = vmatpush2.bf16.msra.mxu1 %v1355_v48 }
  0x96   : > { %775 = vmatprep.subr.bf16.mxu1 %v1356_v50 }
  0x97   : > { %530 = vmatpush2.bf16.msra.mxu0 %v1313_v32 }
  0x98   : > { %531 = vmatprep.subr.bf16.mxu0 %v1314_v35  ;;  %v1391_v35 = vld [vmem:[#allocation7 + $0x40] sm:$0xff]  }
  0x99   : > { %776 = vmatpush2.bf16.msra.mxu1 %v1358_v52 }
  0x9a   : > { %777 = vmatprep.subr.bf16.mxu1 %v1359_v55 }
  0x9b   : > { %532 = vmatpush2.bf16.msra.mxu0 %v1316_v37  ;;  %v304_v37 = vld [vmem:[#allocation9 + $0x1] ss:$8 sm:$0x3] }
  0x9c   : > { %533 = vmatprep.subr.bf16.mxu0 %v1317_v39  ;;  %v590_v38 = vrot.slane %v304_v37, %v341_v18  ;;  %v594_v39 = vrot.slane %v304_v37, %v345_v20 }
  0x9d   : > { %778 = vmatpush2.bf16.msra.mxu1 %v1361_v57 }
  0x9e   : > { %779 = vmatprep.subr.bf16.mxu1 %v1362_v58 }
  0x9f   : > { %534 = vmatpush2.bf16.msra.mxu0 %v1319_v41 }
  0xa0   : > { %535 = vmatprep.subr.bf16.mxu0 %v1320_v43 }
  0xa1   : > { %780 = vmatpush2.bf16.msra.mxu1 %v1364_v59 }
  0xa2   : > { %781 = vmatprep.subr.bf16.mxu1 %v1365_v60 }
  0xa3   : > { %536 = vmatpush2.bf16.msra.mxu0 %v1322_v45 }
  0xa4   : > { %537 = vmatprep.subr.bf16.mxu0 %v1323_v47 }
  0xa5   : > { %782 = vmatpush2.bf16.msra.mxu1 %v1367_v61 }
  0xa6   : > { %783 = vmatprep.subr.bf16.mxu1 %v1368_v62 }
  0xa7   : > { %538 = vmatpush2.bf16.msra.mxu0 %v1325_v49 }
  0xa8   : > { %539 = vmatprep.subr.bf16.mxu0 %v1326_v51  ;;  %v305_v51 = vld [vmem:[#allocation9 + $0x2] ss:$0 sm:$0xff] }
  0xa9   : > { %784 = vmatpush2.bf16.msra.mxu1 %v1370_v63 }
  0xaa   : > { %785 = vmatprep.subr.bf16.mxu1 %v1371_v0 }
  0xab   : > { %540 = vmatpush2.bf16.msra.mxu0 %v1328_v53 }
  0xac   : > { %1175 = vmatprep.subr.bf16.mxu0 %v1377_v4 }
  0xad   : > { %786 = vmatpush2.bf16.msra.mxu1 %v1373_v1 }
  0xae   : > { %542 = vmatmul.mubr.bf16.vlgmr.msra.gmra.mxu0 %v300_v56  ;;  %787 = vmatprep.subr.bf16.mxu1 %v1374_v2 }
  0xaf   : > { %1176 = vmatpush3.bf16.msra.mxu0 %v1378_v5 }
  0xb0   : > { %1177 = vmatprep.subr.bf16.mxu0 %v1379_v6 }
  0xb1   : > { %788 = vmatpush2.bf16.msra.mxu1 %v1376_v3 }
  0xb3   : > { %1178 = vmatpush3.bf16.msra.mxu0 %v1380_v7 }
  0xb4   : > { %1179 = vmatprep.subr.bf16.mxu0 %v1381_v8 }
  0xb7   : > { %1180 = vmatpush3.bf16.msra.mxu0 %v1382_v9 }
  0xb8   : > { %1181 = vmatprep.subr.bf16.mxu0 %v1383_v10 }
  0xbb   : > { %1182 = vmatpush3.bf16.msra.mxu0 %v1384_v11 }
  0xbc   : > { %1183 = vmatprep.subr.bf16.mxu0 %v1385_v12 }
  0xbf   : > { %1184 = vmatpush3.bf16.msra.mxu0 %v1386_v13 }
  0xc0   : > { %1185 = vmatprep.subr.bf16.mxu0 %v1387_v14 }
  0xc3   : > { %1186 = vmatpush3.bf16.msra.mxu0 %v1388_v15 }
  0xc4   : > { %1187 = vmatprep.subr.bf16.mxu0 %v1389_v33 }
  0xc7   : > { %1188 = vmatpush3.bf16.msra.mxu0 %v1390_v34 }
  0xc8   : > { %1189 = vmatprep.subr.bf16.mxu0 %v1391_v35 }
  0xcb   : > { %1190 = vmatpush3.bf16.msra.mxu0 %v1392_v36 }
 0x16e   : > { %v543_v23 = vpop.f32.mrf.mxu0 }
 0x16f   : > { %v544_v24 = vadd.f32 %v543_v23, %v342_v21 }
 0x170   : > { %v545_v25 = vpop.f32.mrf.mxu0 }
 0x171   : > { %v546_v26 = vadd.f32 %v545_v25, %v346_v22  ;;  %v550_v27 = vmax.f32 %v544_v24, 0.0 }
 0x172   : > { %v547_v28 = vpop.f32.mrf.mxu0 }
 0x173   : > { %v551_v29 = vmax.f32 %v546_v26, 0.0  ;;  %v552_v32 = vpack.c.bf16 %v550_v27, %v550_v27 }
 0x174   : > { %v548_v30 = vpop.f32.mrf.mxu0 }
 0x175   : > { %v553_v31 = vpack.c.bf16 %v551_v29, %v551_v29 }
 0x177   : > { %789 = vmatprep.mubr.bf16.mxu1 %v553_v31 }
 0x178   : > { %790 = vmatmul.mubr.bf16.vlgmr.msra.gmra.mxu1 %v552_v32 }
 0x238   : > { %v791_v40 = vpop.f32.mrf.mxu1 }
 0x239   : > { %v792_v41 = vadd.f32 %v791_v40, %v590_v38 }
 0x23a   : > { %v793_v42 = vpop.f32.mrf.mxu1 }
 0x23b   : > { %v794_v43 = vadd.f32 %v793_v42, %v594_v39  ;;  %v798_v44 = vmax.f32 %v792_v41, 0.0 }
 0x23c   : > { %v795_v45 = vpop.f32.mrf.mxu1 }
 0x23d   : > { %v799_v46 = vmax.f32 %v794_v43, 0.0  ;;  %v800_v49 = vpack.c.bf16 %v798_v44, %v798_v44 }
 0x23e   : > { %v796_v47 = vpop.f32.mrf.mxu1 }
 0x23f   : > { %v801_v48 = vpack.c.bf16 %v799_v46, %v799_v46 }
 0x241   : > { %962 = vmatprep.mubr.bf16.mxu0 %v801_v48 }
 0x242   : > { %963 = vmatmul.mubr.bf16.vlgmr.msra.gmra.mxu0 %v800_v49 }
 0x302   : > { %v1191_v50 = vpop.f32.mrf.mxu0 }
 0x304   : > { %v1192_v52 = vpop.f32.mrf.mxu0 }
 0x305   : > { %v1193_v53 = vadd.f32 %v1192_v52, %v1191_v50 }
 0x306   : > { %v1194_v54 = vpop.f32.mrf.mxu0 }
 0x307   : > { %v965_v55 = vadd.f32 %v1193_v53, %v305_v51 }
 0x308   : > { %v1195_v56 = vpop.f32.mrf.mxu0 }
 0x309   : > { %971 = vst.msk [vmem:[%s296_s16] sm:$0xff] %vm970_vm0, %v965_v55 }
 0x30a PF: > { %p17_p2 = scmp.ge.s32.totalorder %s1691_s30, 4   ;;  %s1795_s18 = smov %s1559_s19 }
 0x30b   : > { %s1796_s19 = smov %s1563_s20  ;;  %s1797_s20 = smov %s1703_s8 }
 0x30c   : > { %s1798_s21 = smov %s1691_s30  ;;  %19 = sbr.rel (!%p17_p2) target bundleno = 5 (0x5), region = 97 }
 0x311   :  { %991 = vsyncpa [#allocation3], 1 }
 0x312   :  { %993 = vsyncpa [#allocation3 + $0x1], 1 }
 0x313   :  { %994 = vsyncpa [#allocation5], 1 }
 0x314   :  { %995 = vsyncpa [#allocation8], 1 }

</bundles_post_ra>
